<compile_context>
chip_gen: v5e
topology: v5e:2x2
jax: 0.10.0
libtpu: 0.0.40
codegen_flags: <defaults>
</compile_context>

<pallas_src>
import math
import jax
import jax.numpy as jnp
from jax.experimental import pallas as pl
from jax.experimental.pallas import tpu as pltpu


def _gene_distr_kernel(x_ref, y_ref, w1x_ref, w1y_ref, b1_ref, w2_ref, b2_ref,
                       o_ref, h_ref):
    """grid = (batch tiles i, H tiles j)."""
    j = pl.program_id(1)

    @pl.when(j == 0)
    def _():
        h = jnp.dot(x_ref[...], w1x_ref[...], preferred_element_type=jnp.float32)
        h = h + jnp.dot(y_ref[...], w1y_ref[...], preferred_element_type=jnp.float32)
        h = h + b1_ref[...]
        # LeakyReLU (PyTorch default negative_slope = 0.01)
        h = jnp.where(h >= 0, h, 0.01 * h)
        # Store in the MXU input dtype (bf16): the per-j reload is then cast-free.
        h_ref[...] = h.astype(h_ref.dtype)

    out = jnp.dot(h_ref[...], w2_ref[...], preferred_element_type=jnp.float32)
    out = out + b2_ref[...]
    o_ref[...] = jnp.maximum(out, 0.0).astype(o_ref.dtype)


def _device_caps():
    """Per-generation batch-tile cap + physical VMEM (roofline-driven, see review)."""
    kind = ""
    try:
        kind = jax.devices()[0].device_kind.lower()
    except Exception:
        pass
    if "v7" in kind:                       # ridge ~310 FLOP/B, 64 MiB VMEM
        caps = {"bm_cap": 512, "vmem_phys": 64 << 20}
    elif "v6" in kind:                     # ridge ~680 FLOP/B, 128 MiB VMEM
        caps = {"bm_cap": 768, "vmem_phys": 128 << 20}
    elif "v5" in kind:                     # ridge ~240 FLOP/B, 128 MiB VMEM
        caps = {"bm_cap": 256, "vmem_phys": 128 << 20}
    else:                                  # unknown: conservative
        caps = {"bm_cap": 256, "vmem_phys": 64 << 20}
    try:
        caps["vmem_phys"] = int(pltpu.get_tpu_info().vmem_capacity_bytes)
    except Exception:
        pass
    return caps


def _pick_bm(B, cap):
    bm = max(1, min(B, cap))
    while bm > 1 and B % bm:
        bm -= 1
    return bm


def _pick_tn(H, small_batch=False):
    # Lane-dense column tile of W2 dividing H. Smaller tiles first at tiny batch
    # so the deeper W2 buffering stays cheap.
    order = (256, 512, 384, 128) if small_batch else (512, 384, 256, 128)
    for cand in order:
        if H % cand == 0:
            return cand
    return H  # H not a multiple of 128 -> whole-array block


def _vmem_limit_bytes(bm, tn, input_size, num_labels, L, wbytes, inbytes, outbytes,
                      w1_bufs, w2_bufs, vmem_phys):
    pad8 = lambda n: -(-n // 8) * 8
    pad128 = lambda n: -(-n // 128) * 128
    total = 0
    total += pad8(input_size) * L * wbytes * w1_bufs           # W1x (resident)
    total += pad8(num_labels) * L * wbytes * w1_bufs           # W1y (resident)
    total += 8 * L * 4 * w1_bufs                                # b1 (f32)
    total += pad8(L) * tn * wbytes * w2_bufs                    # W2 column tiles (streamed)
    total += 8 * pad128(tn) * 4 * 2                             # b2 tiles
    total += pad8(bm) * pad128(input_size) * inbytes * 2        # x tiles
    total += pad8(bm) * pad128(num_labels) * inbytes * 2        # y tiles
    total += pad8(bm) * pad128(tn) * outbytes * 2               # out tiles
    total += pad8(bm) * L * wbytes                               # h scratch (bf16)
    total += 4 << 20                                             # headroom / internal scratch
    total = max(total, 16 << 20)
    return int(min(total, int(0.8 * vmem_phys)))


def gene_distr_net(x, y, params, *, bm=None, tn=None, out_dtype=None):
    """x: (B, input_size), y: (B, num_labels). Returns (B, hidden_size)."""
    w1x, w1y, b1, w2, b2 = params
    B, input_size = x.shape
    _, num_labels = y.shape
    L = w1x.shape[1]
    H = w2.shape[1]
    out_dtype = out_dtype or x.dtype
    wdt = w1x.dtype

    caps = _device_caps()
    if bm is None:
        bm = _pick_bm(B, caps["bm_cap"])
    assert B % bm == 0, "batch must be divisible by bm"
    if tn is None:
        tn = _pick_tn(H, small_batch=bm <= 64)
    assert H % tn == 0, "hidden_size must be divisible by tn"

    grid = (B // bm, H // tn)
    # Deeper W2 buffering only when the batch tile is too small to hide DMA latency.
    w2_bufs = 3 if (bm <= 64 and grid[1] >= 3) else 2

    # Cast activations once on the host: halves the x/y DMA, removes in-kernel casts.
    x_in = x.astype(wdt)
    y_in = y.astype(wdt)
    wbytes = jnp.dtype(wdt).itemsize

    def build(use_buffered):
        w1_bufs = 1 if use_buffered else 2
        vmem_limit = _vmem_limit_bytes(bm, tn, input_size, num_labels, L,
                                       wbytes, wbytes, jnp.dtype(out_dtype).itemsize,
                                       w1_bufs, w2_bufs, caps["vmem_phys"])

        def spec(shape, imap, bufs=None):
            if use_buffered and bufs is not None:
                return pl.BlockSpec(shape, imap, pipeline_mode=pl.Buffered(bufs))
            return pl.BlockSpec(shape, imap)

        return pl.pallas_call(
            _gene_distr_kernel,
            out_shape=jax.ShapeDtypeStruct((B, H), out_dtype),
            grid_spec=pltpu.PrefetchScalarGridSpec(
                num_scalar_prefetch=0,
                grid=grid,
                in_specs=[
                    spec((bm, input_size), lambda i, j: (i, 0)),               # x tile
                    spec((bm, num_labels), lambda i, j: (i, 0)),               # y tile
                    spec((input_size, L), lambda i, j: (0, 0), bufs=1),        # W1x (resident, single buf)
                    spec((num_labels, L), lambda i, j: (0, 0), bufs=1),        # W1y (resident, single buf)
                    spec((1, L), lambda i, j: (0, 0), bufs=1),                 # b1  (resident, single buf)
                    spec((L, tn), lambda i, j: (0, j),
                         bufs=w2_bufs if w2_bufs != 2 else None),              # W2 column tile (streamed)
                    spec((1, tn), lambda i, j: (0, j)),                        # b2 column tile
                ],
                out_specs=pl.BlockSpec((bm, tn), lambda i, j: (i, j)),         # lane-dense output tile
                scratch_shapes=[pltpu.VMEM((bm, L), wdt)],                     # h scratch (bf16)
            ),
            compiler_params=pltpu.CompilerParams(
                # Batch tiles are independent -> "parallel" (megacore on multi-TC chips).
                # H axis must stay "arbitrary": h scratch written at j==0 is reused
                # by the remaining j steps of the same batch tile.
                dimension_semantics=("parallel", "arbitrary"),
                vmem_limit_bytes=vmem_limit),
        )

    try:
        return build(True)(x_in, y_in, w1x, w1y, b1, w2, b2)
    except Exception:
        # pipeline_mode / pl.Buffered unavailable in this JAX build: fall back to
        # default double-buffered specs (more VMEM, same semantics).
        return build(False)(x_in, y_in, w1x, w1y, b1, w2, b2)


def init_params(key, input_size, num_labels, latent_size, hidden_size,
                weight_dtype=jnp.bfloat16):
    """Matches the PyTorch module's init:
       - weights: xavier_uniform_ with gain 0.5 on the full (in1, L) fc1 weight,
         then split into x / y halves (equivalent to the host-side concat)
       - biases : PyTorch Linear default uniform(-1/sqrt(fan_in), 1/sqrt(fan_in))
       Weights stored transposed (in_features, out_features) in `weight_dtype`
       (bf16 to halve HBM traffic); biases kept in f32."""
    k1, k2, k3, k4 = jax.random.split(key, 4)
    in1 = input_size + num_labels

    def xavier(k, fan_in, fan_out):
        a = 0.5 * math.sqrt(6.0 / (fan_in + fan_out))
        w = jax.random.uniform(k, (fan_in, fan_out), jnp.float32, minval=-a, maxval=a)
        return w.astype(weight_dtype)

    def bias(k, fan_in, fan_out):
        b = 1.0 / math.sqrt(fan_in)
        return jax.random.uniform(k, (1, fan_out), jnp.float32, minval=-b, maxval=b)

    w1 = xavier(k1, in1, latent_size)
    w1x, w1y = w1[:input_size], w1[input_size:]
    b1 = bias(k2, in1, latent_size)
    w2 = xavier(k3, latent_size, hidden_size)
    b2 = bias(k4, latent_size, hidden_size)
    return (w1x, w1y, b1, w2, b2)


def reference(x, y, params):
    """Plain-JAX reference mirroring the kernel's dtype chain (bf16 MXU inputs +
       bf16 hidden activation, f32 accumulation); semantically identical to the
       PyTorch forward."""
    w1x, w1y, b1, w2, b2 = params
    wdt = w1x.dtype
    h = (jnp.dot(x.astype(wdt), w1x, preferred_element_type=jnp.float32)
         + jnp.dot(y.astype(wdt), w1y, preferred_element_type=jnp.float32)
         + b1)
    h = jnp.where(h >= 0, h, 0.01 * h)                       # LeakyReLU
    out = jnp.dot(h.astype(wdt), w2, preferred_element_type=jnp.float32) + b2
    return jnp.maximum(out, 0.0).astype(x.dtype)             # ReLU


if __name__ == "__main__":
    # Small shapes consistent with the module's forward
    # (real module: input_size=1024, latent=4096, hidden=2048).
    batch = 8
    input_size = 128
    num_labels = 16
    latent_size = 256    # stands in for 4096
    hidden_size = 128    # stands in for 2048

    key = jax.random.PRNGKey(0)
    kx, ky, kp = jax.random.split(key, 3)
    x = jax.random.normal(kx, (batch, input_size), jnp.float32)
    y = jax.nn.one_hot(
        jax.random.randint(ky, (batch,), 0, num_labels), num_labels, dtype=jnp.float32)

    params = init_params(kp, input_size, num_labels, latent_size, hidden_size)

    out = gene_distr_net(x, y, params)
    out = jax.block_until_ready(out)

    ref = reference(x, y, params)
    assert out.shape == (batch, hidden_size)
    assert out.dtype == x.dtype
    assert jnp.allclose(out, ref, atol=2e-3, rtol=2e-3), "mismatch vs reference"

    print("KERNEL_OK")
</pallas_src>

<mosaic_0001>
module attributes {stable_mosaic.version = 11 : i64} {
  func.func @_gene_distr_kernel(%arg0: i32, %arg1: i32, %arg2: memref<8x128xbf16, #tpu.memory_space<vmem>>, %arg3: memref<8x16xbf16, #tpu.memory_space<vmem>>, %arg4: memref<128x256xbf16, #tpu.memory_space<vmem>>, %arg5: memref<16x256xbf16, #tpu.memory_space<vmem>>, %arg6: memref<1x256xf32, #tpu.memory_space<vmem>>, %arg7: memref<256x128xbf16, #tpu.memory_space<vmem>>, %arg8: memref<1x128xf32, #tpu.memory_space<vmem>>, %arg9: memref<8x128xf32, #tpu.memory_space<vmem>>, %arg10: memref<8x256xbf16, #tpu.memory_space<vmem>>) attributes {dimension_semantics = [#tpu.dimension_semantics<parallel>, #tpu.dimension_semantics<arbitrary>], iteration_bounds = array<i64: 1, 1>, scalar_prefetch = 0 : i64, scratch_operands = 1 : i64, tpu.core_type = #tpu.core_type<tc>, window_params = [{transform_indices = @transform_0, window_bounds = array<i64: 8, 128>}, {transform_indices = @transform_1, window_bounds = array<i64: 8, 16>}, {pipeline_mode = #tpu.pipeline_mode<synchronous>, transform_indices = @transform_2, window_bounds = array<i64: 128, 256>}, {pipeline_mode = #tpu.pipeline_mode<synchronous>, transform_indices = @transform_3, window_bounds = array<i64: 16, 256>}, {pipeline_mode = #tpu.pipeline_mode<synchronous>, transform_indices = @transform_4, window_bounds = array<i64: 1, 256>}, {transform_indices = @transform_5, window_bounds = array<i64: 256, 128>}, {transform_indices = @transform_6, window_bounds = array<i64: 1, 128>}, {transform_indices = @transform_7, window_bounds = array<i64: 8, 128>}]} {
    %c0_i32 = arith.constant 0 : i32
    %0 = arith.cmpi eq, %arg1, %c0_i32 : i32
    %1 = arith.extui %0 : i1 to i32
    %c0_i32_0 = arith.constant 0 : i32
    %2 = arith.cmpi ne, %1, %c0_i32_0 : i32
    scf.if %2 {
      %c0_9 = arith.constant 0 : index
      %c0_10 = arith.constant 0 : index
      %12 = vector.load %arg2[%c0_9, %c0_10] : memref<8x128xbf16, #tpu.memory_space<vmem>>, vector<8x128xbf16>
      %c0_11 = arith.constant 0 : index
      %c0_12 = arith.constant 0 : index
      %13 = vector.load %arg4[%c0_11, %c0_12] : memref<128x256xbf16, #tpu.memory_space<vmem>>, vector<128x256xbf16>
      %cst_13 = arith.constant dense<0.000000e+00> : vector<8x256xf32>
      %14 = tpu.matmul %12, %13, %cst_13 {dimension_numbers = #tpu.dot_dimension_numbers<[1], [0], [0], [1], [0, 0, 1, 1], [], []>} : vector<8x128xbf16>, vector<128x256xbf16>, vector<8x256xf32> -> vector<8x256xf32>
      %c0_14 = arith.constant 0 : index
      %c0_15 = arith.constant 0 : index
      %15 = vector.load %arg3[%c0_14, %c0_15] : memref<8x16xbf16, #tpu.memory_space<vmem>>, vector<8x16xbf16>
      %c0_16 = arith.constant 0 : index
      %c0_17 = arith.constant 0 : index
      %16 = vector.load %arg5[%c0_16, %c0_17] : memref<16x256xbf16, #tpu.memory_space<vmem>>, vector<16x256xbf16>
      %cst_18 = arith.constant dense<0.000000e+00> : vector<8x256xf32>
      %17 = tpu.matmul %15, %16, %cst_18 {dimension_numbers = #tpu.dot_dimension_numbers<[1], [0], [0], [1], [0, 0, 1, 1], [], []>} : vector<8x16xbf16>, vector<16x256xbf16>, vector<8x256xf32> -> vector<8x256xf32>
      %18 = arith.addf %14, %17 : vector<8x256xf32>
      %c0_19 = arith.constant 0 : index
      %c0_20 = arith.constant 0 : index
      %19 = vector.load %arg6[%c0_19, %c0_20] : memref<1x256xf32, #tpu.memory_space<vmem>>, vector<1x256xf32>
      %20 = vector.broadcast %19 : vector<1x256xf32> to vector<8x256xf32>
      %21 = arith.addf %18, %20 : vector<8x256xf32>
      %cst_21 = arith.constant 0.000000e+00 : f32
      %22 = vector.broadcast %cst_21 : f32 to vector<8x256xf32>
      %23 = arith.cmpf oge, %21, %22 : vector<8x256xf32>
      %cst_22 = arith.constant 0.00999999977 : f32
      %24 = vector.broadcast %cst_22 : f32 to vector<8x256xf32>
      %25 = arith.mulf %24, %21 : vector<8x256xf32>
      %26 = arith.select %23, %21, %25 : vector<8x256xi1>, vector<8x256xf32>
      %27 = arith.truncf %26 : vector<8x256xf32> to vector<8x256xbf16>
      %c0_23 = arith.constant 0 : index
      %c0_24 = arith.constant 0 : index
      %28 = vector.load %arg10[%c0_23, %c0_24] : memref<8x256xbf16, #tpu.memory_space<vmem>>, vector<8x256xbf16>
      tpu.vector_store %arg10[%c0_23, %c0_24], %27 {strides = array<i32>} : memref<8x256xbf16, #tpu.memory_space<vmem>>, vector<8x256xbf16>,
    } else {
    }
    %c0 = arith.constant 0 : index
    %c0_1 = arith.constant 0 : index
    %3 = vector.load %arg10[%c0, %c0_1] : memref<8x256xbf16, #tpu.memory_space<vmem>>, vector<8x256xbf16>
    %c0_2 = arith.constant 0 : index
    %c0_3 = arith.constant 0 : index
    %4 = vector.load %arg7[%c0_2, %c0_3] : memref<256x128xbf16, #tpu.memory_space<vmem>>, vector<256x128xbf16>
    %cst = arith.constant dense<0.000000e+00> : vector<8x128xf32>
    %5 = tpu.matmul %3, %4, %cst {dimension_numbers = #tpu.dot_dimension_numbers<[1], [0], [0], [1], [0, 0, 1, 1], [], []>} : vector<8x256xbf16>, vector<256x128xbf16>, vector<8x128xf32> -> vector<8x128xf32>
    %c0_4 = arith.constant 0 : index
    %c0_5 = arith.constant 0 : index
    %6 = vector.load %arg8[%c0_4, %c0_5] : memref<1x128xf32, #tpu.memory_space<vmem>>, vector<1x128xf32>
    %7 = vector.broadcast %6 : vector<1x128xf32> to vector<8x128xf32>
    %8 = arith.addf %5, %7 : vector<8x128xf32>
    %cst_6 = arith.constant 0.000000e+00 : f32
    %9 = vector.broadcast %cst_6 : f32 to vector<8x128xf32>
    %10 = arith.maximumf %8, %9 : vector<8x128xf32>
    %c0_7 = arith.constant 0 : index
    %c0_8 = arith.constant 0 : index
    %11 = vector.load %arg9[%c0_7, %c0_8] : memref<8x128xf32, #tpu.memory_space<vmem>>, vector<8x128xf32>
    tpu.vector_store %arg9[%c0_7, %c0_8], %10 {strides = array<i32>} : memref<8x128xf32, #tpu.memory_space<vmem>>, vector<8x128xf32>,
    return
  }
  func.func @transform_0(%arg0: i32, %arg1: i32) -> (i32, i32) {
    %c0_i32 = arith.constant 0 : i32
    %c0_i32_0 = arith.constant 0 : i32
    return %arg0, %c0_i32 : i32, i32
  }
  func.func @transform_1(%arg0: i32, %arg1: i32) -> (i32, i32) {
    %c0_i32 = arith.constant 0 : i32
    %c0_i32_0 = arith.constant 0 : i32
    return %arg0, %c0_i32 : i32, i32
  }
  func.func @transform_2(%arg0: i32, %arg1: i32) -> (i32, i32) {
    %c0_i32 = arith.constant 0 : i32
    %c0_i32_0 = arith.constant 0 : i32
    %c0_i32_1 = arith.constant 0 : i32
    return %c0_i32, %c0_i32_0 : i32, i32
  }
  func.func @transform_3(%arg0: i32, %arg1: i32) -> (i32, i32) {
    %c0_i32 = arith.constant 0 : i32
    %c0_i32_0 = arith.constant 0 : i32
    %c0_i32_1 = arith.constant 0 : i32
    return %c0_i32, %c0_i32_0 : i32, i32
  }
  func.func @transform_4(%arg0: i32, %arg1: i32) -> (i32, i32) {
    %c0_i32 = arith.constant 0 : i32
    %c0_i32_0 = arith.constant 0 : i32
    %c0_i32_1 = arith.constant 0 : i32
    return %c0_i32, %c0_i32_0 : i32, i32
  }
  func.func @transform_5(%arg0: i32, %arg1: i32) -> (i32, i32) {
    %c0_i32 = arith.constant 0 : i32
    %c0_i32_0 = arith.constant 0 : i32
    return %c0_i32, %arg1 : i32, i32
  }
  func.func @transform_6(%arg0: i32, %arg1: i32) -> (i32, i32) {
    %c0_i32 = arith.constant 0 : i32
    %c0_i32_0 = arith.constant 0 : i32
    return %c0_i32, %arg1 : i32, i32
  }
  func.func @transform_7(%arg0: i32, %arg1: i32) -> (i32, i32) {
    %c0_i32 = arith.constant 0 : i32
    return %arg0, %arg1 : i32, i32
  }
}

module attributes {stable_mosaic.version = 11 : i64} {
  func.func @_gene_distr_kernel(%arg0: i32, %arg1: i32, %arg2: memref<8x128xbf16, #tpu.memory_space<vmem>>, %arg3: memref<8x16xbf16, #tpu.memory_space<vmem>>, %arg4: memref<128x256xbf16, #tpu.memory_space<vmem>>, %arg5: memref<16x256xbf16, #tpu.memory_space<vmem>>, %arg6: memref<1x256xf32, #tpu.memory_space<vmem>>, %arg7: memref<256x128xbf16, #tpu.memory_space<vmem>>, %arg8: memref<1x128xf32, #tpu.memory_space<vmem>>, %arg9: memref<8x128xf32, #tpu.memory_space<vmem>>, %arg10: memref<8x256xbf16, #tpu.memory_space<vmem>>) attributes {dimension_semantics = [#tpu.dimension_semantics<parallel>, #tpu.dimension_semantics<arbitrary>], iteration_bounds = array<i64: 1, 1>, scalar_prefetch = 0 : i64, scratch_operands = 1 : i64, tpu.core_type = #tpu.core_type<tc>, window_params = [{transform_indices = @transform_0, window_bounds = array<i64: 8, 128>}, {transform_indices = @transform_1, window_bounds = array<i64: 8, 16>}, {pipeline_mode = #tpu.pipeline_mode<synchronous>, transform_indices = @transform_2, window_bounds = array<i64: 128, 256>}, {pipeline_mode = #tpu.pipeline_mode<synchronous>, transform_indices = @transform_3, window_bounds = array<i64: 16, 256>}, {pipeline_mode = #tpu.pipeline_mode<synchronous>, transform_indices = @transform_4, window_bounds = array<i64: 1, 256>}, {transform_indices = @transform_5, window_bounds = array<i64: 256, 128>}, {transform_indices = @transform_6, window_bounds = array<i64: 1, 128>}, {transform_indices = @transform_7, window_bounds = array<i64: 8, 128>}]} {
    %c0_i32 = arith.constant 0 : i32
    %0 = arith.cmpi eq, %arg1, %c0_i32 : i32
    %1 = arith.extui %0 : i1 to i32
    %c0_i32_0 = arith.constant 0 : i32
    %2 = arith.cmpi ne, %1, %c0_i32_0 : i32
    scf.if %2 {
      %c0_9 = arith.constant 0 : index
      %c0_10 = arith.constant 0 : index
      %12 = vector.load %arg2[%c0_9, %c0_10] : memref<8x128xbf16, #tpu.memory_space<vmem>>, vector<8x128xbf16>
      %c0_11 = arith.constant 0 : index
      %c0_12 = arith.constant 0 : index
      %13 = vector.load %arg4[%c0_11, %c0_12] : memref<128x256xbf16, #tpu.memory_space<vmem>>, vector<128x256xbf16>
      %cst_13 = arith.constant dense<0.000000e+00> : vector<8x256xf32>
      %14 = tpu.matmul %12, %13, %cst_13 {dimension_numbers = #tpu.dot_dimension_numbers<[1], [0], [0], [1], [0, 0, 1, 1], [], []>} : vector<8x128xbf16>, vector<128x256xbf16>, vector<8x256xf32> -> vector<8x256xf32>
      %c0_14 = arith.constant 0 : index
      %c0_15 = arith.constant 0 : index
      %15 = vector.load %arg3[%c0_14, %c0_15] : memref<8x16xbf16, #tpu.memory_space<vmem>>, vector<8x16xbf16>
      %c0_16 = arith.constant 0 : index
      %c0_17 = arith.constant 0 : index
      %16 = vector.load %arg5[%c0_16, %c0_17] : memref<16x256xbf16, #tpu.memory_space<vmem>>, vector<16x256xbf16>
      %cst_18 = arith.constant dense<0.000000e+00> : vector<8x256xf32>
      %17 = tpu.matmul %15, %16, %cst_18 {dimension_numbers = #tpu.dot_dimension_numbers<[1], [0], [0], [1], [0, 0, 1, 1], [], []>} : vector<8x16xbf16>, vector<16x256xbf16>, vector<8x256xf32> -> vector<8x256xf32>
      %18 = arith.addf %14, %17 : vector<8x256xf32>
      %c0_19 = arith.constant 0 : index
      %c0_20 = arith.constant 0 : index
      %19 = vector.load %arg6[%c0_19, %c0_20] : memref<1x256xf32, #tpu.memory_space<vmem>>, vector<1x256xf32>
      %20 = vector.broadcast %19 : vector<1x256xf32> to vector<8x256xf32>
      %21 = arith.addf %18, %20 : vector<8x256xf32>
      %cst_21 = arith.constant 0.000000e+00 : f32
      %22 = vector.broadcast %cst_21 : f32 to vector<8x256xf32>
      %23 = arith.cmpf oge, %21, %22 : vector<8x256xf32>
      %cst_22 = arith.constant 0.00999999977 : f32
      %24 = vector.broadcast %cst_22 : f32 to vector<8x256xf32>
      %25 = arith.mulf %24, %21 : vector<8x256xf32>
      %26 = arith.select %23, %21, %25 : vector<8x256xi1>, vector<8x256xf32>
      %27 = arith.truncf %26 : vector<8x256xf32> to vector<8x256xbf16>
      %c0_23 = arith.constant 0 : index
      %c0_24 = arith.constant 0 : index
      %28 = vector.load %arg10[%c0_23, %c0_24] : memref<8x256xbf16, #tpu.memory_space<vmem>>, vector<8x256xbf16>
      tpu.vector_store %arg10[%c0_23, %c0_24], %27 {strides = array<i32>} : memref<8x256xbf16, #tpu.memory_space<vmem>>, vector<8x256xbf16>,
    } else {
    }
    %c0 = arith.constant 0 : index
    %c0_1 = arith.constant 0 : index
    %3 = vector.load %arg10[%c0, %c0_1] : memref<8x256xbf16, #tpu.memory_space<vmem>>, vector<8x256xbf16>
    %c0_2 = arith.constant 0 : index
    %c0_3 = arith.constant 0 : index
    %4 = vector.load %arg7[%c0_2, %c0_3] : memref<256x128xbf16, #tpu.memory_space<vmem>>, vector<256x128xbf16>
    %cst = arith.constant dense<0.000000e+00> : vector<8x128xf32>
    %5 = tpu.matmul %3, %4, %cst {dimension_numbers = #tpu.dot_dimension_numbers<[1], [0], [0], [1], [0, 0, 1, 1], [], []>} : vector<8x256xbf16>, vector<256x128xbf16>, vector<8x128xf32> -> vector<8x128xf32>
    %c0_4 = arith.constant 0 : index
    %c0_5 = arith.constant 0 : index
    %6 = vector.load %arg8[%c0_4, %c0_5] : memref<1x128xf32, #tpu.memory_space<vmem>>, vector<1x128xf32>
    %7 = vector.broadcast %6 : vector<1x128xf32> to vector<8x128xf32>
    %8 = arith.addf %5, %7 : vector<8x128xf32>
    %cst_6 = arith.constant 0.000000e+00 : f32
    %9 = vector.broadcast %cst_6 : f32 to vector<8x128xf32>
    %10 = arith.maximumf %8, %9 : vector<8x128xf32>
    %c0_7 = arith.constant 0 : index
    %c0_8 = arith.constant 0 : index
    %11 = vector.load %arg9[%c0_7, %c0_8] : memref<8x128xf32, #tpu.memory_space<vmem>>, vector<8x128xf32>
    tpu.vector_store %arg9[%c0_7, %c0_8], %10 {strides = array<i32>} : memref<8x128xf32, #tpu.memory_space<vmem>>, vector<8x128xf32>,
    return
  }
  func.func @transform_0(%arg0: i32, %arg1: i32) -> (i32, i32) {
    %c0_i32 = arith.constant 0 : i32
    %c0_i32_0 = arith.constant 0 : i32
    return %arg0, %c0_i32 : i32, i32
  }
  func.func @transform_1(%arg0: i32, %arg1: i32) -> (i32, i32) {
    %c0_i32 = arith.constant 0 : i32
    %c0_i32_0 = arith.constant 0 : i32
    return %arg0, %c0_i32 : i32, i32
  }
  func.func @transform_2(%arg0: i32, %arg1: i32) -> (i32, i32) {
    %c0_i32 = arith.constant 0 : i32
    %c0_i32_0 = arith.constant 0 : i32
    %c0_i32_1 = arith.constant 0 : i32
    return %c0_i32, %c0_i32_0 : i32, i32
  }
  func.func @transform_3(%arg0: i32, %arg1: i32) -> (i32, i32) {
    %c0_i32 = arith.constant 0 : i32
    %c0_i32_0 = arith.constant 0 : i32
    %c0_i32_1 = arith.constant 0 : i32
    return %c0_i32, %c0_i32_0 : i32, i32
  }
  func.func @transform_4(%arg0: i32, %arg1: i32) -> (i32, i32) {
    %c0_i32 = arith.constant 0 : i32
    %c0_i32_0 = arith.constant 0 : i32
    %c0_i32_1 = arith.constant 0 : i32
    return %c0_i32, %c0_i32_0 : i32, i32
  }
  func.func @transform_5(%arg0: i32, %arg1: i32) -> (i32, i32) {
    %c0_i32 = arith.constant 0 : i32
    %c0_i32_0 = arith.constant 0 : i32
    return %c0_i32, %arg1 : i32, i32
  }
  func.func @transform_6(%arg0: i32, %arg1: i32) -> (i32, i32) {
    %c0_i32 = arith.constant 0 : i32
    %c0_i32_0 = arith.constant 0 : i32
    return %c0_i32, %arg1 : i32, i32
  }
  func.func @transform_7(%arg0: i32, %arg1: i32) -> (i32, i32) {
    %c0_i32 = arith.constant 0 : i32
    return %arg0, %arg1 : i32, i32
  }
}

</mosaic_0001>

<bundles_post_ra>
// kernel: tpu_custom_call.1
= control target key start
LH: loop header
LB: loop body
LE: loop exit
PB: predicated region body
PF: predicated region fallthrough
CT: control target
= control target key end

     0   :  { %12 = vsyncpa [#allocation4], 0  ;;  %s884_s0 = inlined_call_operand.hbm [shape: bf16[8,128], index: 0, kind: input, shape index: {}]   ;;  %s885_s1 = inlined_call_operand.hbm [shape: bf16[8,16], index: 1, kind: input, shape index: {}]   ;;  %s886_s2 = inlined_call_operand.hbm [shape: bf16[128,256], index: 2, kind: input, shape index: {}]   ;;  %s887_s3 = inlined_call_operand.hbm [shape: bf16[16,256], index: 3, kind: input, shape index: {}]   ;;  %s888_s4 = inlined_call_operand.vmem [shape: f32[1,256], index: 4, kind: input, shape index: {}]   ;;  %s889_s5 = inlined_call_operand.hbm [shape: bf16[256,128], index: 5, kind: input, shape index: {}]   ;;  %s890_s6 = inlined_call_operand.vmem [shape: f32[1,128], index: 6, kind: input, shape index: {}]   ;;  %s891_s7 = inlined_call_operand.hbm [shape: f32[8,128], index: 7, kind: output, shape index: {}]  }
   0x1   :  { %13 = vsyncpa [#allocation7], 0 }
   0x2   :  { %14 = vsyncpa [#allocation10], 0  ;;  %s32_s26 = sshll.u32 %s885_s1, 4  ;;  %s33_s26 = int_to_ptr.hbm [resolvable:$true] %s32_s26 }
   0x3   :  { %15 = vsyncpa [#allocation5], 0  ;;  %s810_s27 = smov [#allocation6]   ;;  %s55_s8 = sshll.u32 %s887_s3, 4  ;;  %s56_s8 = int_to_ptr.hbm [resolvable:$true] %s55_s8 }
   0x4   :  { %s34_s28 = sshll.u32 %s810_s27, 4  ;;  %s811_s9 = smov [#allocation9]   ;;  %s35_s28 = int_to_ptr.vmem [resolvable:$true] %s34_s28 }
   0x5   :  { %37 = dma.hbm_to_vmem [thread:$0]  %s33_s26, 64, %s35_s28, [#allocation7]  }
   0x6   :  { %s57_s10 = sshll.u32 %s811_s9, 4  ;;  %s21_s13 = sshll.u32 %s884_s0, 4  ;;  %s58_s10 = int_to_ptr.vmem [resolvable:$true] %s57_s10  ;;  %s22_s13 = int_to_ptr.hbm [resolvable:$true] %s21_s13 }
   0x7   :  { %s812_s1 = smov 128   ;;  %s813_s14 = smov 8  }
   0x8   :  { %63 = dma.hbm_to_vmem [thread:$0]  %s56_s8, 256, %s58_s10, [#allocation10], %s812_s1, %s812_s1, %s813_s14  }
   0x9   :  { %s42_s17 = sshll.u32 %s886_s2, 4  ;;  %s814_s18 = smov [#allocation3]   ;;  %s43_s17 = int_to_ptr.hbm [resolvable:$true] %s42_s17 }
   0xa   :  { %s23_s19 = sshll.u32 %s814_s18, 4  ;;  %s815_s3 = smov [#allocation8]   ;;  %s24_s19 = int_to_ptr.vmem [resolvable:$true] %s23_s19 }
   0xb   :  { %26 = dma.hbm_to_vmem [thread:$0]  %s22_s13, 64, %s24_s19, [#allocation4]  }
   0xc   :  { %s44_s20 = sshll.u32 %s815_s3, 4  ;;  %s70_s0 = sshll.u32 %s889_s5, 4  ;;  %s45_s20 = int_to_ptr.vmem [resolvable:$true] %s44_s20  ;;  %s71_s0 = int_to_ptr.hbm [resolvable:$true] %s70_s0 }
   0xd   :  { %50 = dma.hbm_to_vmem [thread:$0]  %s43_s17, 2048, %s45_s20, [#allocation7], %s812_s1, %s812_s1, %s813_s14  }
   0xe   :  { %s816_s23 = smov [#allocation11]   ;;  %s817_s25 = smov 64  }
   0xf   :  { %s72_s24 = sshll.u32 %s816_s23, 4  ;;  %s818_s26 = smov 4   ;;  %s73_s24 = int_to_ptr.vmem [resolvable:$true] %s72_s24 }
  0x10   :  { %78 = dma.hbm_to_vmem [thread:$0]  %s71_s0, 2048, %s73_s24, [#allocation10], %s817_s25, %s817_s25, %s818_s26  }
  0x11   :  { %802 = dma.done.wait [#allocation4], 64  }
  0x12   :  { %803 = vsyncadd [#allocation4], 4294967232 }
  0x13   :  { %804 = dma.done.wait [#allocation7], 2112  }
  0x14   :  { %805 = vsyncadd [#allocation7], 4294965184 }
  0x15   :  { %806 = dma.done.wait [#allocation10], 2304  }
  0x16   :  { %807 = vsyncadd [#allocation10], 4294964992  ;;  %v543_v0 = vld [vmem:[#allocation8 + $0x70] sm:$0xf]  ;;  %v628_v1 = vld [vmem:[#allocation8 + $0x74] sm:$0xf0] }
  0x17   :  { %v627_v2 = vld [vmem:[#allocation8 + $0x74] sm:$0xf]  ;;  %v544_v3 = vor.u32 %v628_v1, %v543_v0  ;;  %v545_v4 = vld [vmem:[#allocation8 + $0x78] sm:$0xf0]  ;;  %v535_v5 = vld [vmem:[#allocation8 + $0x60] sm:$0xf] }
  0x18   :  { %v626_v6 = vld [vmem:[#allocation8 + $0x64] sm:$0xf0]  ;;  %v548_v7 = vor.u32 %v627_v2, %v545_v4  ;;  %v625_v8 = vld [vmem:[#allocation8 + $0x64] sm:$0xf]  ;;  %v537_v9 = vld [vmem:[#allocation8 + $0x68] sm:$0xf0] }
  0x19   :  { %246 = vmatpush.bf16.msra.mxu2 %v544_v3  ;;  %v536_v10 = vor.u32 %v626_v6, %v535_v5  ;;  %v540_v11 = vor.u32 %v625_v8, %v537_v9  ;;  %v527_v12 = vld [vmem:[#allocation8 + $0x50] sm:$0xf]  ;;  %v624_v13 = vld [vmem:[#allocation8 + $0x54] sm:$0xf0]  ;;  %v623_v14 = vld [vmem:[#allocation8 + $0x54] sm:$0xf] }
  0x1a   :  { %259 = vmatpush.bf16.msra.mxu3 %v548_v7  ;;  %v529_v15 = vld [vmem:[#allocation8 + $0x58] sm:$0xf0]  ;;  %v528_v16 = vor.u32 %v624_v13, %v527_v12  ;;  %v519_v18 = vld [vmem:[#allocation8 + $0x40] sm:$0xf]  ;;  %v622_v19 = vld [vmem:[#allocation8 + $0x44] sm:$0xf0] }
  0x1b   :  { %v532_v17 = vor.u32 %v623_v14, %v529_v15  ;;  %v621_v20 = vld [vmem:[#allocation8 + $0x44] sm:$0xf]  ;;  %v521_v21 = vld [vmem:[#allocation8 + $0x48] sm:$0xf0]  ;;  %v477_v22 = vld [vmem:[#allocation9] sm:$0xf]  ;;  %v520_v27 = vor.u32 %v622_v19, %v519_v18 }
  0x1c   :  { %v630_v23 = vld [vmem:[#allocation9 + $0x4] sm:$0xf0]  ;;  %v629_v25 = vld [vmem:[#allocation9 + $0x4] sm:$0xf]  ;;  %v479_v26 = vld [vmem:[#allocation9 + $0x8] sm:$0xf0]  ;;  %v524_v30 = vor.u32 %v621_v20, %v521_v21 }
  0x1d   :  { %247 = vmatpush.bf16.msra.mxu2 %v536_v10  ;;  %v478_v24 = vor.u32 %v630_v23, %v477_v22  ;;  %v511_v28 = vld [vmem:[#allocation8 + $0x30] sm:$0xf]  ;;  %v482_v29 = vor.u32 %v629_v25, %v479_v26  ;;  %v620_v31 = vld [vmem:[#allocation8 + $0x34] sm:$0xf0]  ;;  %v123_v32 = vld [vmem:[#allocation6] sm:$0xf] }
  0x1e   :  { %260 = vmatpush.bf16.msra.mxu3 %v540_v11  ;;  %vm136_vm0 = vcmask 130048   ;;  %v638_v33 = vld [vmem:[#allocation11 + $0x38] sm:$0xff]  ;;  %v619_v34 = vld [vmem:[#allocation8 + $0x34] sm:$0xf]  ;;  %v513_v35 = vld [vmem:[#allocation8 + $0x38] sm:$0xf0]  ;;  %v512_v38 = vor.u32 %v620_v31, %v511_v28 }
  0x1f   :  { %147 = vmatpush.bf16.msra.mxu0 %v478_v24  ;;  %160 = vmatpush.bf16.msra.mxu1 %v482_v29  ;;  %v646_v36 = vld [vmem:[#allocation11 + $0x78] sm:$0xff]  ;;  %v637_v37 = vld [vmem:[#allocation11 + $0x30] sm:$0xff]  ;;  %v516_v39 = vor.u32 %v619_v34, %v513_v35  ;;  %v636_v45 = vld [vmem:[#allocation11 + $0x28] sm:$0xff]  ;;  %s819_s28 = smov [#allocation12]   ;;  %s463_s9 = sshll.u32 %s891_s7, 4  ;;  %s464_s9 = int_to_ptr.hbm [resolvable:$true] %s463_s9 }
  0x20   :  { %v503_v40 = vld [vmem:[#allocation8 + $0x20] sm:$0xf]  ;;  %v618_v41 = vld [vmem:[#allocation8 + $0x24] sm:$0xf0]  ;;  %v617_v42 = vld [vmem:[#allocation8 + $0x24] sm:$0xf] }
  0x21   :  { %248 = vmatpush.bf16.msra.mxu2 %v528_v16  ;;  %v505_v43 = vld [vmem:[#allocation8 + $0x28] sm:$0xf0]  ;;  %v645_v44 = vld [vmem:[#allocation11 + $0x70] sm:$0xff]  ;;  %v504_v46 = vor.u32 %v618_v41, %v503_v40  ;;  %v495_v48 = vld [vmem:[#allocation8 + $0x10] sm:$0xf]  ;;  %s461_s29 = sshll.u32 %s819_s28, 4  ;;  %s462_s29 = int_to_ptr.vmem [resolvable:$true] %s461_s29 }
  0x22   :  { %261 = vmatpush.bf16.msra.mxu3 %v532_v17  ;;  %483 = vmatmul.msk.bf16.vlgmr.msra.gmra.mxu0 %vm136_vm0, %v123_v32  ;;  %v508_v47 = vor.u32 %v617_v42, %v505_v43  ;;  %v616_v49 = vld [vmem:[#allocation8 + $0x14] sm:$0xf0]  ;;  %v615_v50 = vld [vmem:[#allocation8 + $0x14] sm:$0xf]  ;;  %v497_v51 = vld [vmem:[#allocation8 + $0x18] sm:$0xf0] }
  0x23   :  { %428 = vmatpush.bf16.msrb.mxu0 %v638_v33  ;;  %484 = vmatmul.msk.bf16.vlgmr.msra.gmra.mxu1 %vm136_vm0, %v123_v32  ;;  %v644_v52 = vld [vmem:[#allocation11 + $0x68] sm:$0xff]  ;;  %v496_v53 = vor.u32 %v616_v49, %v495_v48  ;;  %v500_v54 = vor.u32 %v615_v50, %v497_v51  ;;  %v487_v55 = vld [vmem:[#allocation8] sm:$0xf]  ;;  %v614_v56 = vld [vmem:[#allocation8 + $0x4] sm:$0xf0] }
  0x24   :  { %441 = vmatpush.bf16.msrb.mxu1 %v646_v36  ;;  %v613_v57 = vld [vmem:[#allocation8 + $0x4] sm:$0xf]  ;;  %v489_v58 = vld [vmem:[#allocation8 + $0x8] sm:$0xf0]  ;;  %v488_v59 = vor.u32 %v614_v56, %v487_v55  ;;  %v106_v61 = vld [vmem:[#allocation3] sm:$0xf] }
  0x25   :  { %249 = vmatpush.bf16.msra.mxu2 %v520_v27  ;;  %v492_v60 = vor.u32 %v613_v57, %v489_v58  ;;  %v635_v62 = vld [vmem:[#allocation11 + $0x20] sm:$0xff]  ;;  %v634_v0 = vld [vmem:[#allocation11 + $0x18] sm:$0xff]  ;;  %v633_v2 = vld [vmem:[#allocation11 + $0x10] sm:$0xff] }
  0x26   :  { %262 = vmatpush.bf16.msra.mxu3 %v524_v30  ;;  %v643_v63 = vld [vmem:[#allocation11 + $0x60] sm:$0xff]  ;;  %v642_v1 = vld [vmem:[#allocation11 + $0x58] sm:$0xff]  ;;  %v641_v3 = vld [vmem:[#allocation11 + $0x50] sm:$0xff] }
  0x27   :  { %429 = vmatpush.bf16.msrb.mxu0 %v637_v37  ;;  %v632_v4 = vld [vmem:[#allocation11 + $0x8] sm:$0xff]  ;;  %v631_v8 = vld [vmem:[#allocation11] sm:$0xff] }
  0x28   :  { %442 = vmatpush.bf16.msrb.mxu1 %v645_v44  ;;  %v640_v5 = vld [vmem:[#allocation11 + $0x48] sm:$0xff]  ;;  %v639_v9 = vld [vmem:[#allocation11 + $0x40] sm:$0xff] }
  0x29   :  { %250 = vmatpush.bf16.msra.mxu2 %v512_v38  ;;  %v272_v12 = vld [vmem:[%s888_s4] sm:$0x3] }
  0x2a   :  { %263 = vmatpush.bf16.msra.mxu3 %v516_v39  ;;  %v274_v13 = vperm.slane %v272_v12, 0  ;;  %v275_v15 = vperm.slane %v272_v12, 1  ;;  %v657_v32 = vld [vmem:[%s890_s6] ss:$0 sm:$0xff] }
  0x2b   :  { %430 = vmatpush.bf16.msrb.mxu0 %v636_v45 }
  0x2c   :  { %443 = vmatpush.bf16.msrb.mxu1 %v644_v52 }
  0x2d   :  { %251 = vmatpush.bf16.msra.mxu2 %v504_v46 }
  0x2e   :  { %264 = vmatpush.bf16.msra.mxu3 %v508_v47 }
  0x2f   :  { %431 = vmatpush.bf16.msrb.mxu0 %v635_v62 }
  0x30   :  { %444 = vmatpush.bf16.msrb.mxu1 %v643_v63 }
  0x31   :  { %252 = vmatpush.bf16.msra.mxu2 %v496_v53 }
  0x32   :  { %265 = vmatpush.bf16.msra.mxu3 %v500_v54 }
  0x33   :  { %432 = vmatpush.bf16.msrb.mxu0 %v634_v0 }
  0x34   :  { %445 = vmatpush.bf16.msrb.mxu1 %v642_v1 }
  0x35   :  { %253 = vmatpush.bf16.msra.mxu2 %v488_v59 }
  0x36   :  { %266 = vmatpush.bf16.msra.mxu3 %v492_v60 }
  0x37   :  { %433 = vmatpush.bf16.msrb.mxu0 %v633_v2 }
  0x38   :  { %254 = vmatmul.bf16.vlgmr.msra.gmra.mxu2 %v106_v61  ;;  %446 = vmatpush.bf16.msrb.mxu1 %v641_v3 }
  0x39   :  { %267 = vmatmul.bf16.vlgmr.msra.gmra.mxu3 %v106_v61 }
  0x3b   :  { %434 = vmatpush.bf16.msrb.mxu0 %v632_v4 }
  0x3c   :  { %447 = vmatpush.bf16.msrb.mxu1 %v640_v5 }
  0x3f   :  { %435 = vmatpush.bf16.msrb.mxu0 %v631_v8 }
  0x40   :  { %448 = vmatpush.bf16.msrb.mxu1 %v639_v9 }
  0x9f   :  { %v149_v6 = vpop.f32.mrf.mxu0 }
  0xa0   :  { %v162_v7 = vpop.f32.mrf.mxu1 }
  0xa7   :  { %v151_v10 = vpop.f32.mrf.mxu0 }
  0xa8   :  { %v164_v11 = vpop.f32.mrf.mxu1 }
  0xbb   :  { %v255_v14 = vpop.f32.mrf.mxu2 }
  0xbc   :  { %v256_v16 = vadd.f32 %v255_v14, %v149_v6  ;;  %v268_v17 = vpop.f32.mrf.mxu3 }
  0xbd   :  { %v269_v18 = vadd.f32 %v268_v17, %v162_v7 }
  0xbe   :  { %v278_v19 = vadd.f32 %v274_v13, %v256_v16 }
  0xbf   :  { %v279_v20 = vadd.f32 %v275_v15, %v269_v18 }
  0xc0   :  { %vm280_vm1 = vcmp.ge.f32.partialorder %v278_v19, 0.0  ;;  %v282_v21 = vmul.f32 0.01, %v278_v19 }
  0xc1   :  { %vm281_vm2 = vcmp.ge.f32.partialorder %v279_v20, 0.0  ;;  %v283_v22 = vmul.f32 0.01, %v279_v20 }
  0xc2   :  { %v284_v23 = vsel %vm280_vm1, %v278_v19, %v282_v21 }
  0xc3   :  { %v285_v24 = vsel %vm281_vm2, %v279_v20, %v283_v22  ;;  %v257_v25 = vpop.f32.mrf.mxu2 }
  0xc4   :  { %v270_v26 = vpop.f32.mrf.mxu3  ;;  %v286_v27 = vpack.c.bf16 %v285_v24, %v284_v23 }
  0xc6   :  { %v326_v28 = vunpack.c.l.b16 %v286_v27  ;;  %v327_v29 = vunpack.c.h.b16 %v286_v27 }
  0xc8   :  { %v328_v30 = vpack.c.b16 %v326_v28, %v326_v28  ;;  %v329_v31 = vpack.c.b16 %v327_v29, %v327_v29 }
  0xca   :  { %436 = vmatmul.bf16.vlgmr.msrb.gmra.mxu0 %v328_v30  ;;  %449 = vmatmul.bf16.vlgmr.msrb.gmra.mxu1 %v329_v31 }
 0x147   :  { %v437_v33 = vpop.f32.mrf.mxu0  ;;  %v450_v34 = vpop.f32.mrf.mxu1 }
 0x148   :  { %v438_v35 = vadd.f32 %v657_v32, %v437_v33 }
 0x14a   :  { %v451_v36 = vadd.f32 %v450_v34, %v438_v35 }
 0x14c   :  { %v454_v37 = vmax.f32 %v451_v36, 0.0 }
 0x14e   :  { %455 = vst [vmem:[#allocation12] sm:$0xff] %v454_v37 }
 0x14f   :  { %v439_v38 = vpop.f32.mrf.mxu0  ;;  %v452_v39 = vpop.f32.mrf.mxu1  ;;  %466 = dma.vmem_to_hbm [thread:$0]  %s462_s29, 128, %s464_s9, [#allocation5]  }
 0x150   :  { %808 = dma.done.wait [#allocation5], 128  }
 0x151   :  { %809 = vsyncadd [#allocation5], 4294967168 }
 0x152   :  { %471 = vsyncpa [#allocation4], 1 }
 0x153   :  { %472 = vsyncpa [#allocation7], 1 }
 0x154   :  { %473 = vsyncpa [#allocation10], 1 }
 0x155   :  { %474 = vsyncpa [#allocation5], 1 }

// kernel: tpu_custom_call.1
= control target key start
LH: loop header
LB: loop body
LE: loop exit
PB: predicated region body
PF: predicated region fallthrough
CT: control target
= control target key end

     0   :  { %12 = vsyncpa [#allocation4], 0  ;;  %s884_s0 = inlined_call_operand.hbm [shape: bf16[8,128], index: 0, kind: input, shape index: {}]   ;;  %s885_s1 = inlined_call_operand.hbm [shape: bf16[8,16], index: 1, kind: input, shape index: {}]   ;;  %s886_s2 = inlined_call_operand.hbm [shape: bf16[128,256], index: 2, kind: input, shape index: {}]   ;;  %s887_s3 = inlined_call_operand.hbm [shape: bf16[16,256], index: 3, kind: input, shape index: {}]   ;;  %s888_s4 = inlined_call_operand.vmem [shape: f32[1,256], index: 4, kind: input, shape index: {}]   ;;  %s889_s5 = inlined_call_operand.hbm [shape: bf16[256,128], index: 5, kind: input, shape index: {}]   ;;  %s890_s6 = inlined_call_operand.vmem [shape: f32[1,128], index: 6, kind: input, shape index: {}]   ;;  %s891_s7 = inlined_call_operand.hbm [shape: f32[8,128], index: 7, kind: output, shape index: {}]  }
   0x1   :  { %13 = vsyncpa [#allocation7], 0 }
   0x2   :  { %14 = vsyncpa [#allocation10], 0  ;;  %s32_s26 = sshll.u32 %s885_s1, 4  ;;  %s33_s26 = int_to_ptr.hbm [resolvable:$true] %s32_s26 }
   0x3   :  { %15 = vsyncpa [#allocation5], 0  ;;  %s810_s27 = smov [#allocation6]   ;;  %s55_s8 = sshll.u32 %s887_s3, 4  ;;  %s56_s8 = int_to_ptr.hbm [resolvable:$true] %s55_s8 }
   0x4   :  { %s34_s28 = sshll.u32 %s810_s27, 4  ;;  %s811_s9 = smov [#allocation9]   ;;  %s35_s28 = int_to_ptr.vmem [resolvable:$true] %s34_s28 }
   0x5   :  { %37 = dma.hbm_to_vmem [thread:$0]  %s33_s26, 64, %s35_s28, [#allocation7]  }
   0x6   :  { %s57_s10 = sshll.u32 %s811_s9, 4  ;;  %s21_s13 = sshll.u32 %s884_s0, 4  ;;  %s58_s10 = int_to_ptr.vmem [resolvable:$true] %s57_s10  ;;  %s22_s13 = int_to_ptr.hbm [resolvable:$true] %s21_s13 }
   0x7   :  { %s812_s1 = smov 128   ;;  %s813_s14 = smov 8  }
   0x8   :  { %63 = dma.hbm_to_vmem [thread:$0]  %s56_s8, 256, %s58_s10, [#allocation10], %s812_s1, %s812_s1, %s813_s14  }
   0x9   :  { %s42_s17 = sshll.u32 %s886_s2, 4  ;;  %s814_s18 = smov [#allocation3]   ;;  %s43_s17 = int_to_ptr.hbm [resolvable:$true] %s42_s17 }
   0xa   :  { %s23_s19 = sshll.u32 %s814_s18, 4  ;;  %s815_s3 = smov [#allocation8]   ;;  %s24_s19 = int_to_ptr.vmem [resolvable:$true] %s23_s19 }
   0xb   :  { %26 = dma.hbm_to_vmem [thread:$0]  %s22_s13, 64, %s24_s19, [#allocation4]  }
   0xc   :  { %s44_s20 = sshll.u32 %s815_s3, 4  ;;  %s70_s0 = sshll.u32 %s889_s5, 4  ;;  %s45_s20 = int_to_ptr.vmem [resolvable:$true] %s44_s20  ;;  %s71_s0 = int_to_ptr.hbm [resolvable:$true] %s70_s0 }
   0xd   :  { %50 = dma.hbm_to_vmem [thread:$0]  %s43_s17, 2048, %s45_s20, [#allocation7], %s812_s1, %s812_s1, %s813_s14  }
   0xe   :  { %s816_s23 = smov [#allocation11]   ;;  %s817_s25 = smov 64  }
   0xf   :  { %s72_s24 = sshll.u32 %s816_s23, 4  ;;  %s818_s26 = smov 4   ;;  %s73_s24 = int_to_ptr.vmem [resolvable:$true] %s72_s24 }
  0x10   :  { %78 = dma.hbm_to_vmem [thread:$0]  %s71_s0, 2048, %s73_s24, [#allocation10], %s817_s25, %s817_s25, %s818_s26  }
  0x11   :  { %802 = dma.done.wait [#allocation4], 64  }
  0x12   :  { %803 = vsyncadd [#allocation4], 4294967232 }
  0x13   :  { %804 = dma.done.wait [#allocation7], 2112  }
  0x14   :  { %805 = vsyncadd [#allocation7], 4294965184 }
  0x15   :  { %806 = dma.done.wait [#allocation10], 2304  }
  0x16   :  { %807 = vsyncadd [#allocation10], 4294964992  ;;  %v543_v0 = vld [vmem:[#allocation8 + $0x70] sm:$0xf]  ;;  %v628_v1 = vld [vmem:[#allocation8 + $0x74] sm:$0xf0] }
  0x17   :  { %v627_v2 = vld [vmem:[#allocation8 + $0x74] sm:$0xf]  ;;  %v544_v3 = vor.u32 %v628_v1, %v543_v0  ;;  %v545_v4 = vld [vmem:[#allocation8 + $0x78] sm:$0xf0]  ;;  %v535_v5 = vld [vmem:[#allocation8 + $0x60] sm:$0xf] }
  0x18   :  { %v626_v6 = vld [vmem:[#allocation8 + $0x64] sm:$0xf0]  ;;  %v548_v7 = vor.u32 %v627_v2, %v545_v4  ;;  %v625_v8 = vld [vmem:[#allocation8 + $0x64] sm:$0xf]  ;;  %v537_v9 = vld [vmem:[#allocation8 + $0x68] sm:$0xf0] }
  0x19   :  { %246 = vmatpush.bf16.msra.mxu2 %v544_v3  ;;  %v536_v10 = vor.u32 %v626_v6, %v535_v5  ;;  %v540_v11 = vor.u32 %v625_v8, %v537_v9  ;;  %v527_v12 = vld [vmem:[#allocation8 + $0x50] sm:$0xf]  ;;  %v624_v13 = vld [vmem:[#allocation8 + $0x54] sm:$0xf0]  ;;  %v623_v14 = vld [vmem:[#allocation8 + $0x54] sm:$0xf] }
  0x1a   :  { %259 = vmatpush.bf16.msra.mxu3 %v548_v7  ;;  %v529_v15 = vld [vmem:[#allocation8 + $0x58] sm:$0xf0]  ;;  %v528_v16 = vor.u32 %v624_v13, %v527_v12  ;;  %v519_v18 = vld [vmem:[#allocation8 + $0x40] sm:$0xf]  ;;  %v622_v19 = vld [vmem:[#allocation8 + $0x44] sm:$0xf0] }
  0x1b   :  { %v532_v17 = vor.u32 %v623_v14, %v529_v15  ;;  %v621_v20 = vld [vmem:[#allocation8 + $0x44] sm:$0xf]  ;;  %v521_v21 = vld [vmem:[#allocation8 + $0x48] sm:$0xf0]  ;;  %v477_v22 = vld [vmem:[#allocation9] sm:$0xf]  ;;  %v520_v27 = vor.u32 %v622_v19, %v519_v18 }
  0x1c   :  { %v630_v23 = vld [vmem:[#allocation9 + $0x4] sm:$0xf0]  ;;  %v629_v25 = vld [vmem:[#allocation9 + $0x4] sm:$0xf]  ;;  %v479_v26 = vld [vmem:[#allocation9 + $0x8] sm:$0xf0]  ;;  %v524_v30 = vor.u32 %v621_v20, %v521_v21 }
  0x1d   :  { %247 = vmatpush.bf16.msra.mxu2 %v536_v10  ;;  %v478_v24 = vor.u32 %v630_v23, %v477_v22  ;;  %v511_v28 = vld [vmem:[#allocation8 + $0x30] sm:$0xf]  ;;  %v482_v29 = vor.u32 %v629_v25, %v479_v26  ;;  %v620_v31 = vld [vmem:[#allocation8 + $0x34] sm:$0xf0]  ;;  %v123_v32 = vld [vmem:[#allocation6] sm:$0xf] }
  0x1e   :  { %260 = vmatpush.bf16.msra.mxu3 %v540_v11  ;;  %vm136_vm0 = vcmask 130048   ;;  %v638_v33 = vld [vmem:[#allocation11 + $0x38] sm:$0xff]  ;;  %v619_v34 = vld [vmem:[#allocation8 + $0x34] sm:$0xf]  ;;  %v513_v35 = vld [vmem:[#allocation8 + $0x38] sm:$0xf0]  ;;  %v512_v38 = vor.u32 %v620_v31, %v511_v28 }
  0x1f   :  { %147 = vmatpush.bf16.msra.mxu0 %v478_v24  ;;  %160 = vmatpush.bf16.msra.mxu1 %v482_v29  ;;  %v646_v36 = vld [vmem:[#allocation11 + $0x78] sm:$0xff]  ;;  %v637_v37 = vld [vmem:[#allocation11 + $0x30] sm:$0xff]  ;;  %v516_v39 = vor.u32 %v619_v34, %v513_v35  ;;  %v636_v45 = vld [vmem:[#allocation11 + $0x28] sm:$0xff]  ;;  %s819_s28 = smov [#allocation12]   ;;  %s463_s9 = sshll.u32 %s891_s7, 4  ;;  %s464_s9 = int_to_ptr.hbm [resolvable:$true] %s463_s9 }
  0x20   :  { %v503_v40 = vld [vmem:[#allocation8 + $0x20] sm:$0xf]  ;;  %v618_v41 = vld [vmem:[#allocation8 + $0x24] sm:$0xf0]  ;;  %v617_v42 = vld [vmem:[#allocation8 + $0x24] sm:$0xf] }
  0x21   :  { %248 = vmatpush.bf16.msra.mxu2 %v528_v16  ;;  %v505_v43 = vld [vmem:[#allocation8 + $0x28] sm:$0xf0]  ;;  %v645_v44 = vld [vmem:[#allocation11 + $0x70] sm:$0xff]  ;;  %v504_v46 = vor.u32 %v618_v41, %v503_v40  ;;  %v495_v48 = vld [vmem:[#allocation8 + $0x10] sm:$0xf]  ;;  %s461_s29 = sshll.u32 %s819_s28, 4  ;;  %s462_s29 = int_to_ptr.vmem [resolvable:$true] %s461_s29 }
  0x22   :  { %261 = vmatpush.bf16.msra.mxu3 %v532_v17  ;;  %483 = vmatmul.msk.bf16.vlgmr.msra.gmra.mxu0 %vm136_vm0, %v123_v32  ;;  %v508_v47 = vor.u32 %v617_v42, %v505_v43  ;;  %v616_v49 = vld [vmem:[#allocation8 + $0x14] sm:$0xf0]  ;;  %v615_v50 = vld [vmem:[#allocation8 + $0x14] sm:$0xf]  ;;  %v497_v51 = vld [vmem:[#allocation8 + $0x18] sm:$0xf0] }
  0x23   :  { %428 = vmatpush.bf16.msrb.mxu0 %v638_v33  ;;  %484 = vmatmul.msk.bf16.vlgmr.msra.gmra.mxu1 %vm136_vm0, %v123_v32  ;;  %v644_v52 = vld [vmem:[#allocation11 + $0x68] sm:$0xff]  ;;  %v496_v53 = vor.u32 %v616_v49, %v495_v48  ;;  %v500_v54 = vor.u32 %v615_v50, %v497_v51  ;;  %v487_v55 = vld [vmem:[#allocation8] sm:$0xf]  ;;  %v614_v56 = vld [vmem:[#allocation8 + $0x4] sm:$0xf0] }
  0x24   :  { %441 = vmatpush.bf16.msrb.mxu1 %v646_v36  ;;  %v613_v57 = vld [vmem:[#allocation8 + $0x4] sm:$0xf]  ;;  %v489_v58 = vld [vmem:[#allocation8 + $0x8] sm:$0xf0]  ;;  %v488_v59 = vor.u32 %v614_v56, %v487_v55  ;;  %v106_v61 = vld [vmem:[#allocation3] sm:$0xf] }
  0x25   :  { %249 = vmatpush.bf16.msra.mxu2 %v520_v27  ;;  %v492_v60 = vor.u32 %v613_v57, %v489_v58  ;;  %v635_v62 = vld [vmem:[#allocation11 + $0x20] sm:$0xff]  ;;  %v634_v0 = vld [vmem:[#allocation11 + $0x18] sm:$0xff]  ;;  %v633_v2 = vld [vmem:[#allocation11 + $0x10] sm:$0xff] }
  0x26   :  { %262 = vmatpush.bf16.msra.mxu3 %v524_v30  ;;  %v643_v63 = vld [vmem:[#allocation11 + $0x60] sm:$0xff]  ;;  %v642_v1 = vld [vmem:[#allocation11 + $0x58] sm:$0xff]  ;;  %v641_v3 = vld [vmem:[#allocation11 + $0x50] sm:$0xff] }
  0x27   :  { %429 = vmatpush.bf16.msrb.mxu0 %v637_v37  ;;  %v632_v4 = vld [vmem:[#allocation11 + $0x8] sm:$0xff]  ;;  %v631_v8 = vld [vmem:[#allocation11] sm:$0xff] }
  0x28   :  { %442 = vmatpush.bf16.msrb.mxu1 %v645_v44  ;;  %v640_v5 = vld [vmem:[#allocation11 + $0x48] sm:$0xff]  ;;  %v639_v9 = vld [vmem:[#allocation11 + $0x40] sm:$0xff] }
  0x29   :  { %250 = vmatpush.bf16.msra.mxu2 %v512_v38  ;;  %v272_v12 = vld [vmem:[%s888_s4] sm:$0x3] }
  0x2a   :  { %263 = vmatpush.bf16.msra.mxu3 %v516_v39  ;;  %v274_v13 = vperm.slane %v272_v12, 0  ;;  %v275_v15 = vperm.slane %v272_v12, 1  ;;  %v657_v32 = vld [vmem:[%s890_s6] ss:$0 sm:$0xff] }
  0x2b   :  { %430 = vmatpush.bf16.msrb.mxu0 %v636_v45 }
  0x2c   :  { %443 = vmatpush.bf16.msrb.mxu1 %v644_v52 }
  0x2d   :  { %251 = vmatpush.bf16.msra.mxu2 %v504_v46 }
  0x2e   :  { %264 = vmatpush.bf16.msra.mxu3 %v508_v47 }
  0x2f   :  { %431 = vmatpush.bf16.msrb.mxu0 %v635_v62 }
  0x30   :  { %444 = vmatpush.bf16.msrb.mxu1 %v643_v63 }
  0x31   :  { %252 = vmatpush.bf16.msra.mxu2 %v496_v53 }
  0x32   :  { %265 = vmatpush.bf16.msra.mxu3 %v500_v54 }
  0x33   :  { %432 = vmatpush.bf16.msrb.mxu0 %v634_v0 }
  0x34   :  { %445 = vmatpush.bf16.msrb.mxu1 %v642_v1 }
  0x35   :  { %253 = vmatpush.bf16.msra.mxu2 %v488_v59 }
  0x36   :  { %266 = vmatpush.bf16.msra.mxu3 %v492_v60 }
  0x37   :  { %433 = vmatpush.bf16.msrb.mxu0 %v633_v2 }
  0x38   :  { %254 = vmatmul.bf16.vlgmr.msra.gmra.mxu2 %v106_v61  ;;  %446 = vmatpush.bf16.msrb.mxu1 %v641_v3 }
  0x39   :  { %267 = vmatmul.bf16.vlgmr.msra.gmra.mxu3 %v106_v61 }
  0x3b   :  { %434 = vmatpush.bf16.msrb.mxu0 %v632_v4 }
  0x3c   :  { %447 = vmatpush.bf16.msrb.mxu1 %v640_v5 }
  0x3f   :  { %435 = vmatpush.bf16.msrb.mxu0 %v631_v8 }
  0x40   :  { %448 = vmatpush.bf16.msrb.mxu1 %v639_v9 }
  0x9f   :  { %v149_v6 = vpop.f32.mrf.mxu0 }
  0xa0   :  { %v162_v7 = vpop.f32.mrf.mxu1 }
  0xa7   :  { %v151_v10 = vpop.f32.mrf.mxu0 }
  0xa8   :  { %v164_v11 = vpop.f32.mrf.mxu1 }
  0xbb   :  { %v255_v14 = vpop.f32.mrf.mxu2 }
  0xbc   :  { %v256_v16 = vadd.f32 %v255_v14, %v149_v6  ;;  %v268_v17 = vpop.f32.mrf.mxu3 }
  0xbd   :  { %v269_v18 = vadd.f32 %v268_v17, %v162_v7 }
  0xbe   :  { %v278_v19 = vadd.f32 %v274_v13, %v256_v16 }
  0xbf   :  { %v279_v20 = vadd.f32 %v275_v15, %v269_v18 }
  0xc0   :  { %vm280_vm1 = vcmp.ge.f32.partialorder %v278_v19, 0.0  ;;  %v282_v21 = vmul.f32 0.01, %v278_v19 }
  0xc1   :  { %vm281_vm2 = vcmp.ge.f32.partialorder %v279_v20, 0.0  ;;  %v283_v22 = vmul.f32 0.01, %v279_v20 }
  0xc2   :  { %v284_v23 = vsel %vm280_vm1, %v278_v19, %v282_v21 }
  0xc3   :  { %v285_v24 = vsel %vm281_vm2, %v279_v20, %v283_v22  ;;  %v257_v25 = vpop.f32.mrf.mxu2 }
  0xc4   :  { %v270_v26 = vpop.f32.mrf.mxu3  ;;  %v286_v27 = vpack.c.bf16 %v285_v24, %v284_v23 }
  0xc6   :  { %v326_v28 = vunpack.c.l.b16 %v286_v27  ;;  %v327_v29 = vunpack.c.h.b16 %v286_v27 }
  0xc8   :  { %v328_v30 = vpack.c.b16 %v326_v28, %v326_v28  ;;  %v329_v31 = vpack.c.b16 %v327_v29, %v327_v29 }
  0xca   :  { %436 = vmatmul.bf16.vlgmr.msrb.gmra.mxu0 %v328_v30  ;;  %449 = vmatmul.bf16.vlgmr.msrb.gmra.mxu1 %v329_v31 }
 0x147   :  { %v437_v33 = vpop.f32.mrf.mxu0  ;;  %v450_v34 = vpop.f32.mrf.mxu1 }
 0x148   :  { %v438_v35 = vadd.f32 %v657_v32, %v437_v33 }
 0x14a   :  { %v451_v36 = vadd.f32 %v450_v34, %v438_v35 }
 0x14c   :  { %v454_v37 = vmax.f32 %v451_v36, 0.0 }
 0x14e   :  { %455 = vst [vmem:[#allocation12] sm:$0xff] %v454_v37 }
 0x14f   :  { %v439_v38 = vpop.f32.mrf.mxu0  ;;  %v452_v39 = vpop.f32.mrf.mxu1  ;;  %466 = dma.vmem_to_hbm [thread:$0]  %s462_s29, 128, %s464_s9, [#allocation5]  }
 0x150   :  { %808 = dma.done.wait [#allocation5], 128  }
 0x151   :  { %809 = vsyncadd [#allocation5], 4294967168 }
 0x152   :  { %471 = vsyncpa [#allocation4], 1 }
 0x153   :  { %472 = vsyncpa [#allocation7], 1 }
 0x154   :  { %473 = vsyncpa [#allocation10], 1 }
 0x155   :  { %474 = vsyncpa [#allocation5], 1 }

</bundles_post_ra>
